<compile_context>
chip_gen: v6e
topology: v6e:2x2x1
jax: 0.10.0
libtpu: 0.0.40
codegen_flags: <defaults>
</compile_context>

<pallas_src>
import functools

import jax
import jax.numpy as jnp
from jax import lax
from jax.experimental import pallas as pl
from jax.experimental.pallas import tpu as pltpu


def _tile(dim, target, align):
    """Tile for a non-reduction dim: the full dim if small enough, else the
    largest multiple of `align` <= target that divides `dim`, else the largest
    multiple of `align` <= target (grid then uses pl.cdiv; ragged boundary
    blocks are masked / have their OOB writes dropped)."""
    if dim <= target:
        return dim
    top = (target // align) * align
    cand = top
    while cand >= align:
        if dim % cand == 0:
            return cand
        cand -= align
    return top


def _reduce_tile(dim, target):
    """Tile for a contraction dim: must divide `dim` exactly (no masking on the
    K axis); falls back to the full dim if no 128-aligned divisor exists."""
    if dim <= target:
        return dim
    cand = (target // 128) * 128
    while cand >= 128:
        if dim % cand == 0:
            return cand
        cand -= 128
    return dim


# ---------------------------------------------------------------------------
# Tiled linear:  out = x @ W + b   (bf16 operands, f32 accumulation)
# ---------------------------------------------------------------------------
def _linear_kernel(x_ref, w_ref, b_ref, o_ref, acc_ref):
    @pl.when(pl.program_id(2) == 0)
    def _():
        # Initialise the accumulator with the (broadcast) bias instead of zeros:
        # removes a full (tm, tn) VPU add from the last-K-step epilogue.
        acc_ref[...] = jnp.broadcast_to(
            b_ref[...].astype(jnp.float32), acc_ref.shape)

    acc_ref[...] += jnp.dot(
        x_ref[...], w_ref[...], preferred_element_type=jnp.float32)

    @pl.when(pl.program_id(2) == pl.num_programs(2) - 1)
    def _():
        o_ref[...] = acc_ref[...].astype(o_ref.dtype)


def linear(x2d, w, b, *, tm=256, tn=512, tk=256):
    M, K = x2d.shape
    K2, Nout = w.shape
    assert K == K2
    tm = _tile(M, tm, 8)        # sublane-aligned, cdiv grid (OOB writes dropped)
    tn = _tile(Nout, tn, 128)   # lane-aligned, cdiv grid
    tk = _reduce_tile(K, tk)    # exact divisor (K-pipelined accumulator)
    b2d = b.reshape(1, Nout)

    gm, gn, gk = pl.cdiv(M, tm), pl.cdiv(Nout, tn), K // tk
    itemsize = x2d.dtype.itemsize
    cost = pl.CostEstimate(
        flops=2 * M * K * Nout,
        transcendentals=0,
        bytes_accessed=(M * K * itemsize * gn          # x re-streamed per N tile
                        + K * Nout * itemsize * gm     # w re-streamed per M tile
                        + M * Nout * itemsize + Nout * 4),
    )
    return pl.pallas_call(
        _linear_kernel,
        out_shape=jax.ShapeDtypeStruct((M, Nout), x2d.dtype),
        grid=(gm, gn, gk),
        in_specs=[
            pl.BlockSpec((tm, tk), lambda i, j, k: (i, k)),
            pl.BlockSpec((tk, tn), lambda i, j, k: (k, j)),
            pl.BlockSpec((1, tn), lambda i, j, k: (0, j)),
        ],
        out_specs=pl.BlockSpec((tm, tn), lambda i, j, k: (i, j)),
        scratch_shapes=[pltpu.VMEM((tm, tn), jnp.float32)],
        compiler_params=pltpu.CompilerParams(
            dimension_semantics=("parallel", "parallel", "arbitrary"),
            vmem_limit_bytes=32 * 1024 * 1024,
        ),
        cost_estimate=cost,
    )(x2d, w, b2d)


# ---------------------------------------------------------------------------
# Flash-style scaled-dot-product attention (online softmax over KV tiles).
# Inputs (B, H, S, D); output written lane-dense as (B, N, C) with C = H*D.
# The softmax scale is already folded into the Q-projection weights.
# ---------------------------------------------------------------------------
def _flash_kernel(q_ref, k_ref, v_ref, o_ref, m_ref, l_ref, acc_ref,
                  *, num_heads, head_dim, kv_len, kv_tile, mask_kv):
    kv = pl.program_id(2)

    @pl.when(kv == 0)
    def _():
        m_ref[...] = jnp.full(m_ref.shape, -1e30, dtype=m_ref.dtype)
        l_ref[...] = jnp.zeros_like(l_ref)
        acc_ref[...] = jnp.zeros_like(acc_ref)

    # Matmul operands stay in their native dtype (bf16 on the MXU); accumulate
    # in f32 via preferred_element_type.
    q = q_ref[...]        # (H, tq, D) — scale already folded into w_qkv
    k = k_ref[...]        # (H, tkv, D)
    v = v_ref[...]        # (H, tkv, D)

    # (H, tq, D) x (H, tkv, D) -> (H, tq, tkv): batch over heads, contract D.
    s = lax.dot_general(
        q, k, dimension_numbers=(((2,), (2,)), ((0,), (0,))),
        preferred_element_type=jnp.float32)

    if mask_kv:  # only traced in when the kv length is ragged w.r.t. the tile
        col = kv * kv_tile + lax.broadcasted_iota(jnp.int32, s.shape, 2)
        s = jnp.where(col < kv_len, s, -1e30)

    m_prev = m_ref[...]
    m_new = jnp.maximum(m_prev, jnp.max(s, axis=-1, keepdims=True))
    alpha = jnp.exp(m_prev - m_new)
    p = jnp.exp(s - m_new)
    l_ref[...] = alpha * l_ref[...] + jnp.sum(p, axis=-1, keepdims=True)

    # (H, tq, tkv) x (H, tkv, D) -> (H, tq, D)
    pv = lax.dot_general(
        p.astype(v.dtype), v, dimension_numbers=(((2,), (1,)), ((0,), (0,))),
        preferred_element_type=jnp.float32)
    acc_ref[...] = alpha * acc_ref[...] + pv
    m_ref[...] = m_new

    @pl.when(kv == pl.num_programs(2) - 1)
    def _():
        inv = pl.reciprocal(l_ref[...], approx=True)        # (H, tq, 1)
        out = (acc_ref[...] * inv).astype(o_ref.dtype)      # (H, tq, D)
        # Re-layout (H, tq, D) -> (tq, H*D) with static lane-slice stores so the
        # HBM writeback is a single lane-dense (tq, C) DMA (no output transpose).
        for h in range(num_heads):
            o_ref[:, h * head_dim:(h + 1) * head_dim] = out[h]


def sdpa(q, k, v, *, tq=128, tkv=256):
    B, H, N, D = q.shape
    M = k.shape[2]
    C = H * D
    tq = _tile(N, tq, 8)
    tkv = _tile(M, tkv, 128)
    n_q, n_kv = pl.cdiv(N, tq), pl.cdiv(M, tkv)
    mask_kv = (M % tkv) != 0

    itemsize = q.dtype.itemsize
    cost = pl.CostEstimate(
        flops=4 * B * H * N * M * D,
        transcendentals=B * H * N * M,
        bytes_accessed=(q.size + B * N * C) * itemsize
        + (k.size + v.size) * itemsize * n_q,     # K/V re-streamed per q tile
    )
    kern = functools.partial(
        _flash_kernel, num_heads=H, head_dim=D,
        kv_len=M, kv_tile=tkv, mask_kv=mask_kv)
    return pl.pallas_call(
        kern,
        out_shape=jax.ShapeDtypeStruct((B, N, C), q.dtype),
        grid=(B, n_q, n_kv),
        in_specs=[
            pl.BlockSpec((None, H, tq, D), lambda b, qi, ki: (b, 0, qi, 0)),
            pl.BlockSpec((None, H, tkv, D), lambda b, qi, ki: (b, 0, ki, 0)),
            pl.BlockSpec((None, H, tkv, D), lambda b, qi, ki: (b, 0, ki, 0)),
        ],
        out_specs=pl.BlockSpec((None, tq, C), lambda b, qi, ki: (b, qi, 0)),
        scratch_shapes=[
            pltpu.VMEM((H, tq, 1), jnp.float32),   # running max
            pltpu.VMEM((H, tq, 1), jnp.float32),   # running denom
            pltpu.VMEM((H, tq, D), jnp.float32),   # output accumulator
        ],
        compiler_params=pltpu.CompilerParams(
            dimension_semantics=("parallel", "parallel", "arbitrary"),
            vmem_limit_bytes=32 * 1024 * 1024,
        ),
        cost_estimate=cost,
    )(q, k, v)


# ---------------------------------------------------------------------------
# Module wrapper (parameters initialized deterministically in-script)
# ---------------------------------------------------------------------------
class Attention:
    def __init__(self, dim, num_heads=8, qkv_bias=False, qk_scale=None, *, key):
        self.num_heads = num_heads
        self.dim = dim
        head_dim = dim // num_heads
        self.scale = qk_scale or head_dim ** (-0.5)

        k1, k2, k3 = jax.random.split(key, 3)
        # Raw parameters (module semantics). Weights stored (in, out) so kernels
        # compute x @ W + b; kept in bf16 (halves DMA bytes, native MXU rate).
        self.w_qkv = (jax.random.normal(k1, (dim, dim * 3), jnp.float32) * 0.02
                      ).astype(jnp.bfloat16)
        self.b_qkv = jnp.zeros((dim * 3,), jnp.float32)   # qkv_bias=False -> zeros
        self.w_proj = (jax.random.normal(k2, (dim, dim), jnp.float32) * 0.02
                       ).astype(jnp.bfloat16)
        self.b_proj = jax.random.normal(k3, (dim,), jnp.float32) * 0.02

        # Kernel-side fused weights: softmax scale folded into the Q projection
        # so the flash kernel never multiplies q (q is resident across kv tiles).
        colscale = jnp.concatenate([
            jnp.full((dim,), self.scale, jnp.float32),
            jnp.ones((2 * dim,), jnp.float32)])
        self.w_qkv_fused = (self.w_qkv.astype(jnp.float32) * colscale[None, :]
                            ).astype(jnp.bfloat16)
        self.b_qkv_fused = self.b_qkv * colscale

    def __call__(self, x, prompt=None):
        B, N, C = x.shape
        H = self.num_heads
        D = C // H
        xb = x.astype(jnp.bfloat16)

        qkv = linear(xb.reshape(B * N, C), self.w_qkv_fused, self.b_qkv_fused)
        # TODO(synk): the head permute below and the prompt K/V concat could be
        # folded into the sdpa BlockSpec index_maps (squeezed '3' axis + a kv-
        # segment grid axis) to avoid these XLA-level HBM copies entirely.
        qkv = qkv.reshape(B, N, 3, H, D).transpose(2, 0, 3, 1, 4)  # (3,B,H,N,D)
        q, k, v = qkv[0], qkv[1], qkv[2]

        if prompt is not None:
            pk, pv = prompt
            pk = pk.astype(jnp.bfloat16).reshape(B, -1, H, D).transpose(0, 2, 1, 3)
            pv = pv.astype(jnp.bfloat16).reshape(B, -1, H, D).transpose(0, 2, 1, 3)
            k = jnp.concatenate((pk, k), axis=2)
            v = jnp.concatenate((pv, v), axis=2)

        out = sdpa(q, k, v)                                 # (B, N, C) lane-dense
        out = linear(out.reshape(B * N, C), self.w_proj, self.b_proj)
        return out.reshape(B, N, C)


# ---------------------------------------------------------------------------
# Pure-JAX reference (original PyTorch semantics, f32 math from bf16 weights)
# ---------------------------------------------------------------------------
def reference(attn, x, prompt=None):
    B, N, C = x.shape
    H, D = attn.num_heads, C // attn.num_heads
    f32 = jnp.float32
    xb = x.astype(jnp.bfloat16).astype(f32)
    w_qkv, w_proj = attn.w_qkv.astype(f32), attn.w_proj.astype(f32)

    qkv = (xb.reshape(B * N, C) @ w_qkv + attn.b_qkv).reshape(B, N, 3, H, D)
    qkv = qkv.transpose(2, 0, 3, 1, 4)
    q, k, v = qkv[0], qkv[1], qkv[2]
    if prompt is not None:
        pk, pv = prompt
        pk = pk.astype(f32).reshape(B, -1, H, D).transpose(0, 2, 1, 3)
        pv = pv.astype(f32).reshape(B, -1, H, D).transpose(0, 2, 1, 3)
        k = jnp.concatenate((pk, k), axis=2)
        v = jnp.concatenate((pv, v), axis=2)
    s = jnp.einsum("bhnd,bhmd->bhnm", q, k) * attn.scale
    p = jax.nn.softmax(s, axis=-1)
    o = jnp.einsum("bhnm,bhmd->bhnd", p, v)
    o = o.transpose(0, 2, 1, 3).reshape(B * N, C)
    return (o @ w_proj + attn.b_proj).reshape(B, N, C)


if __name__ == "__main__":
    B, N, C, H = 2, 8, 32, 8   # seq=8, hidden=32, 8 heads -> head_dim=4
    Lp = 8                     # prompt length

    root = jax.random.PRNGKey(0)
    kx, kp1, kp2, kparams = jax.random.split(root, 4)

    x = jax.random.normal(kx, (B, N, C), jnp.float32)
    pk = jax.random.normal(kp1, (B, Lp, C), jnp.float32)
    pv = jax.random.normal(kp2, (B, Lp, C), jnp.float32)

    attn = Attention(dim=C, num_heads=H, key=kparams)

    out = jax.block_until_ready(attn(x, prompt=(pk, pv)))
    assert out.shape == (B, N, C)
    ref = reference(attn, x, prompt=(pk, pv))
    # Tolerance covers bf16 activations/weights, online softmax, approx reciprocal.
    assert jnp.allclose(out.astype(jnp.float32), ref, rtol=5e-2, atol=5e-3), \
        "mismatch vs reference (prompt path)"

    # also exercise the prompt=None path
    out2 = jax.block_until_ready(attn(x, prompt=None))
    ref2 = reference(attn, x, prompt=None)
    assert jnp.allclose(out2.astype(jnp.float32), ref2, rtol=5e-2, atol=5e-3), \
        "mismatch vs reference (no-prompt path)"

    print("KERNEL_OK")
</pallas_src>

<mosaic_0001>
module attributes {stable_mosaic.version = 11 : i64} {
  func.func @_linear_kernel(%arg0: i32, %arg1: i32, %arg2: i32, %arg3: memref<16x32xbf16, #tpu.memory_space<vmem>>, %arg4: memref<32x96xbf16, #tpu.memory_space<vmem>>, %arg5: memref<1x96xf32, #tpu.memory_space<vmem>>, %arg6: memref<16x96xbf16, #tpu.memory_space<vmem>>, %arg7: memref<16x96xf32, #tpu.memory_space<vmem>>) attributes {dimension_semantics = [#tpu.dimension_semantics<parallel>, #tpu.dimension_semantics<parallel>, #tpu.dimension_semantics<arbitrary>], iteration_bounds = array<i64: 1, 1, 1>, scalar_prefetch = 0 : i64, scratch_operands = 1 : i64, tpu.core_type = #tpu.core_type<tc>, window_params = [{transform_indices = @transform_0, window_bounds = array<i64: 16, 32>}, {transform_indices = @transform_1, window_bounds = array<i64: 32, 96>}, {transform_indices = @transform_2, window_bounds = array<i64: 1, 96>}, {transform_indices = @transform_3, window_bounds = array<i64: 16, 96>}]} {
    %c0_i32 = arith.constant 0 : i32
    %0 = arith.cmpi eq, %arg2, %c0_i32 : i32
    %1 = arith.extui %0 : i1 to i32
    %c0_i32_0 = arith.constant 0 : i32
    %2 = arith.cmpi ne, %1, %c0_i32_0 : i32
    scf.if %2 {
      %c0_10 = arith.constant 0 : index
      %c0_11 = arith.constant 0 : index
      %12 = vector.load %arg5[%c0_10, %c0_11] : memref<1x96xf32, #tpu.memory_space<vmem>>, vector<1x96xf32>
      %13 = vector.shape_cast %12 : vector<1x96xf32> to vector<1x96xf32>
      %14 = vector.broadcast %13 : vector<1x96xf32> to vector<16x96xf32>
      %c0_12 = arith.constant 0 : index
      %c0_13 = arith.constant 0 : index
      %15 = vector.load %arg7[%c0_12, %c0_13] : memref<16x96xf32, #tpu.memory_space<vmem>>, vector<16x96xf32>
      tpu.vector_store %arg7[%c0_12, %c0_13], %14 {strides = array<i32>} : memref<16x96xf32, #tpu.memory_space<vmem>>, vector<16x96xf32>,
    } else {
    }
    %c0 = arith.constant 0 : index
    %c0_1 = arith.constant 0 : index
    %3 = vector.load %arg7[%c0, %c0_1] : memref<16x96xf32, #tpu.memory_space<vmem>>, vector<16x96xf32>
    %c0_2 = arith.constant 0 : index
    %c0_3 = arith.constant 0 : index
    %4 = vector.load %arg3[%c0_2, %c0_3] : memref<16x32xbf16, #tpu.memory_space<vmem>>, vector<16x32xbf16>
    %c0_4 = arith.constant 0 : index
    %c0_5 = arith.constant 0 : index
    %5 = vector.load %arg4[%c0_4, %c0_5] : memref<32x96xbf16, #tpu.memory_space<vmem>>, vector<32x96xbf16>
    %cst = arith.constant dense<0.000000e+00> : vector<16x96xf32>
    %6 = tpu.matmul %4, %5, %cst {dimension_numbers = #tpu.dot_dimension_numbers<[1], [0], [0], [1], [0, 0, 1, 1], [], []>} : vector<16x32xbf16>, vector<32x96xbf16>, vector<16x96xf32> -> vector<16x96xf32>
    %7 = arith.addf %3, %6 : vector<16x96xf32>
    %c0_6 = arith.constant 0 : index
    %c0_7 = arith.constant 0 : index
    %8 = vector.load %arg7[%c0_6, %c0_7] : memref<16x96xf32, #tpu.memory_space<vmem>>, vector<16x96xf32>
    tpu.vector_store %arg7[%c0_6, %c0_7], %7 {strides = array<i32>} : memref<16x96xf32, #tpu.memory_space<vmem>>, vector<16x96xf32>,
    %c0_i32_8 = arith.constant 0 : i32
    %9 = arith.cmpi eq, %arg2, %c0_i32_8 : i32
    %10 = arith.extui %9 : i1 to i32
    %c0_i32_9 = arith.constant 0 : i32
    %11 = arith.cmpi ne, %10, %c0_i32_9 : i32
    scf.if %11 {
      %c0_10 = arith.constant 0 : index
      %c0_11 = arith.constant 0 : index
      %12 = vector.load %arg7[%c0_10, %c0_11] : memref<16x96xf32, #tpu.memory_space<vmem>>, vector<16x96xf32>
      %13 = arith.truncf %12 : vector<16x96xf32> to vector<16x96xbf16>
      %c0_12 = arith.constant 0 : index
      %c0_13 = arith.constant 0 : index
      %14 = vector.load %arg6[%c0_12, %c0_13] : memref<16x96xbf16, #tpu.memory_space<vmem>>, vector<16x96xbf16>
      tpu.vector_store %arg6[%c0_12, %c0_13], %13 {strides = array<i32>} : memref<16x96xbf16, #tpu.memory_space<vmem>>, vector<16x96xbf16>,
    } else {
    }
    return
  }
  func.func @transform_0(%arg0: i32, %arg1: i32, %arg2: i32) -> (i32, i32) {
    %c0_i32 = arith.constant 0 : i32
    return %arg0, %arg2 : i32, i32
  }
  func.func @transform_1(%arg0: i32, %arg1: i32, %arg2: i32) -> (i32, i32) {
    %c0_i32 = arith.constant 0 : i32
    return %arg2, %arg1 : i32, i32
  }
  func.func @transform_2(%arg0: i32, %arg1: i32, %arg2: i32) -> (i32, i32) {
    %c0_i32 = arith.constant 0 : i32
    %c0_i32_0 = arith.constant 0 : i32
    return %c0_i32, %arg1 : i32, i32
  }
  func.func @transform_3(%arg0: i32, %arg1: i32, %arg2: i32) -> (i32, i32) {
    %c0_i32 = arith.constant 0 : i32
    return %arg0, %arg1 : i32, i32
  }
}

</mosaic_0001>

<bundles_post_ra>
// kernel: tpu_custom_call.1
= control target key start
LH: loop header
LB: loop body
LE: loop exit
PB: predicated region body
PF: predicated region fallthrough
CT: control target
= control target key end

     0   :  { %8 = vsyncpa [#allocation4], 0  ;;  %s315_s0 = inlined_call_operand.hbm [shape: bf16[16,32], index: 0, kind: input, shape index: {}]   ;;  %s316_s1 = inlined_call_operand.hbm [shape: bf16[32,96], index: 1, kind: input, shape index: {}]   ;;  %s317_s2 = inlined_call_operand.vmem [shape: f32[1,96], index: 2, kind: input, shape index: {}]   ;;  %s318_s3 = inlined_call_operand.hbm [shape: bf16[16,96], index: 3, kind: output, shape index: {}]  }
   0x1   :  { %9 = vsyncpa [#allocation7], 0 }
   0x2   :  { %10 = vsyncpa [#allocation5], 0  ;;  %s263_s12 = smov [#allocation3]  }
   0x3   :  { %s16_s13 = sshll.u32 %s263_s12, 4  ;;  %s17_s13 = int_to_ptr.vmem [resolvable:$true] %s16_s13 }
   0x4   :  { %s205_s14 = scalar_lea.vmem %s17_s13, 128  ;;  %p210_p1 = scmp.lt.s32.totalorder %s17_s13, %s17_s13 }
   0x5   :  { %p206_p0 = scmp.ne.s32.totalorder %s17_s13, %s205_s14  ;;  %p211_p2 = scmp.lt.s32.totalorder %s205_s14, %s205_s14 }
   0x7   :  { %p212_p3 = por %p211_p2, %p210_p1 }
   0x9   :  { %p213_p4 = pnand %p212_p3, %p206_p0 }
   0xb   :  { %216 = shalt.err (!%p213_p4)
}
   0xc   :  { %s264_s15 = smov 64   ;;  %s265_s16 = smov 4  }
   0xd   :  { %22 = dma.hbm_to_vmem [thread:$0]  %s315_s0, 128, %s17_s13, [#allocation4], %s264_s15, %s264_s15, %s265_s16  }
   0xe   :  { %s266_s19 = smov [#allocation6]  }
   0xf   :  { %s28_s20 = sshll.u32 %s266_s19, 4  ;;  %s29_s20 = int_to_ptr.vmem [resolvable:$true] %s28_s20 }
  0x10   :  { %s225_s21 = scalar_lea.vmem %s29_s20, 256  ;;  %p230_p6 = scmp.lt.s32.totalorder %s29_s20, %s29_s20 }
  0x11   :  { %p226_p5 = scmp.ne.s32.totalorder %s29_s20, %s225_s21  ;;  %p231_p7 = scmp.lt.s32.totalorder %s225_s21, %s225_s21 }
  0x13   :  { %p232_p8 = por %p231_p7, %p230_p6 }
  0x15   :  { %p233_p9 = pnand %p232_p8, %p226_p5 }
  0x17   :  { %236 = shalt.err (!%p233_p9)
}
  0x18   :  { %34 = dma.hbm_to_vmem [thread:$0]  %s316_s1, 256, %s29_s20, [#allocation7], %s264_s15, %s264_s15, %s265_s16  }
  0x19   :  { %257 = dma.done.wait [#allocation4], 128  }
  0x1a   :  { %258 = vsyncadd [#allocation4], 4294967168 }
  0x1b   :  { %259 = dma.done.wait [#allocation7], 256  }
  0x1c   :  { %260 = vsyncadd [#allocation7], 4294967040  ;;  %v267_v0 = vmov 0.0   ;;  %vm268_vm0 = vmmov 0   ;;  %v194_v1 = vld [vmem:[#allocation6 + $0x8] sm:$0xff]   ;;  %vm55_vm1 = vcmask 785408  }
  0x1d   :  { %179 = vmatprep.subr.bf16.mxu0 %v267_v0  ;;  %183 = vmatprep.mubr.msk.bf16.mxu0 %vm268_vm0, %v267_v0  ;;  %v195_v2 = vld [vmem:[#allocation6] sm:$0xff]   ;;  %v167_v3 = vld [vmem:[%s317_s2] ss:$0 sm:$0xff]  ;;  %v196_v4 = vld [vmem:[#allocation3] sm:$0xff]   ;;  %vm83_vm2 = vcmask 261120   ;;  %vm146_vm3 = vcmask 781312  }
  0x1e   :  { %180 = vmatpush3.bf16.msra.mxu0 %v194_v1  ;;  %56 = vst.msk [vmem:[#allocation2] sm:$0xff] %vm55_vm1, %v167_v3  ;;  %57 = vst.msk [vmem:[#allocation2 + $0x8] sm:$0xff] %vm55_vm1, %v167_v3  ;;  %s269_s1 = smov [#allocation8]  }
  0x1f   :  { %181 = vmatprep.subr.bf16.mxu0 %v267_v0  ;;  %s154_s2 = sshll.u32 %s269_s1, 4  ;;  %s155_s2 = int_to_ptr.vmem [resolvable:$true] %s154_s2 }
  0x20   :  { %s237_s25 = scalar_lea.vmem %s155_s2, 128  ;;  %p242_p11 = scmp.lt.s32.totalorder %s155_s2, %s155_s2 }
  0x21   :  { %p238_p10 = scmp.ne.s32.totalorder %s155_s2, %s237_s25  ;;  %p243_p12 = scmp.lt.s32.totalorder %s237_s25, %s237_s25 }
  0x22   :  { %182 = vmatpush3.bf16.msra.mxu0 %v195_v2 }
  0x23   :  { %p244_p13 = por %p243_p12, %p242_p11 }
  0x25   :  { %184 = vmatmul.mubr.msk.bf16.vlgmr.msra.gmra.mxu0 %vm83_vm2, %v196_v4  ;;  %v58_v5 = vld [vmem:[#allocation2] sm:$0xff]  ;;  %v59_v9 = vld [vmem:[#allocation2 + $0x8] sm:$0xff]  ;;  %p245_p0 = pnand %p244_p13, %p238_p10 }
  0xe5   :  { %v121_v6 = vpop.f32.mrf.mxu0 }
  0xe6   :  { %v128_v7 = vadd.f32 %v121_v6, %v58_v5 }
  0xe7   :  { %v185_v8 = vpop.f32.mrf.mxu0 }
  0xe8   :  { %131 = vst.msk [vmem:[#allocation2] sm:$0xff] %vm55_vm1, %v128_v7 }
  0xe9   :  { %v124_v10 = vpop.f32.mrf.mxu0 }
  0xea   :  { %v129_v11 = vadd.f32 %v124_v10, %v59_v9 }
  0xeb   :  { %v186_v12 = vpop.f32.mrf.mxu0 }
  0xec   :  { %132 = vst.msk [vmem:[#allocation2 + $0x8] sm:$0xff] %vm55_vm1, %v129_v11 }
  0xef   :  { %v136_v13 = vld [vmem:[#allocation2] sm:$0xff] }
  0xf0   :  { %v174_v14 = vpack.c.bf16 %v136_v13, %v136_v13 }
  0xf2   :  { %147 = vst.msk [vmem:[#allocation8] sm:$0xf] %vm146_vm3, %v174_v14 }
  0xf3   :  { %v137_v15 = vld [vmem:[#allocation2 + $0x8] sm:$0xff] }
  0xf4   :  { %v175_v16 = vpack.c.bf16 %v137_v15, %v137_v15 }
  0xf6   :  { %148 = vst.msk [vmem:[#allocation8 + $0x4] sm:$0xf] %vm146_vm3, %v175_v16 }
  0xf7   :  { %248 = shalt.err (!%p245_p0)
}
  0xf8   :  { %160 = dma.vmem_to_hbm [thread:$0]  %s155_s2, 128, %s318_s3, [#allocation5], %s264_s15, %s264_s15, %s265_s16  }
  0xf9   :  { %261 = dma.done.wait [#allocation5], 128  }
  0xfa   :  { %262 = vsyncadd [#allocation5], 4294967168 }
  0xfb   :  { %164 = vsyncpa [#allocation4], 1 }
  0xfc   :  { %165 = vsyncpa [#allocation7], 1 }
  0xfd   :  { %166 = vsyncpa [#allocation5], 1 }

</bundles_post_ra>
